<compile_context>
chip_gen: v6e
topology: v6e:2x2x1
jax: 0.10.0
libtpu: 0.0.40
codegen_flags: <defaults>
</compile_context>

<pallas_src>
import jax
import jax.numpy as jnp
from jax import lax
from jax.experimental import pallas as pl
from jax.experimental.pallas import tpu as pltpu


# ----------------------------------------------------------------------------
# Parameter init (mirrors PyTorch nn.Embedding + nn.GRU parameter layout)
# ----------------------------------------------------------------------------
def init_encoder_params(key, input_dim, emb_dim, hidden_dim):
    ks = jax.random.split(key, 9)
    bound = 1.0 / jnp.sqrt(jnp.float32(hidden_dim))

    def u(k, shape):
        return jax.random.uniform(k, shape, jnp.float32, -bound, bound)

    return {
        "embedding": jax.random.normal(ks[0], (input_dim, emb_dim), jnp.float32),
        # forward direction (weight_ih_l0 / weight_hh_l0, rows = [W_r; W_z; W_n])
        "w_ih_f": u(ks[1], (3 * hidden_dim, emb_dim)),
        "w_hh_f": u(ks[2], (3 * hidden_dim, hidden_dim)),
        "b_ih_f": u(ks[3], (3 * hidden_dim,)),
        "b_hh_f": u(ks[4], (3 * hidden_dim,)),
        # backward direction (weight_ih_l0_reverse / ...)
        "w_ih_b": u(ks[5], (3 * hidden_dim, emb_dim)),
        "w_hh_b": u(ks[6], (3 * hidden_dim, hidden_dim)),
        "b_ih_b": u(ks[7], (3 * hidden_dim,)),
        "b_hh_b": u(ks[8], (3 * hidden_dim,)),
    }


# ----------------------------------------------------------------------------
# One-time packing: fold embedding + input weights + biases into a single
# block-diagonal lookup/projection table, and build the block-diagonal hidden
# weight.  Column order everywhere: [r_f | r_b | z_f | z_b | n_f | n_b].
# ----------------------------------------------------------------------------
def pack_encoder_params(params, hidden_dim):
    H = hidden_dim
    hi = lax.Precision.HIGHEST
    emb = params["embedding"]                       # (V, E)
    V = emb.shape[0]
    KP = max(128, ((2 * V + 127) // 128) * 128)     # padded contraction dim

    def split3(a):
        return a[:H], a[H:2 * H], a[2 * H:]

    w_ir_f, w_iz_f, w_in_f = split3(params["w_ih_f"])
    w_ir_b, w_iz_b, w_in_b = split3(params["w_ih_b"])
    w_hr_f, w_hz_f, w_hn_f = split3(params["w_hh_f"])
    w_hr_b, w_hz_b, w_hn_b = split3(params["w_hh_b"])
    b_ir_f, b_iz_f, b_in_f = split3(params["b_ih_f"])
    b_ir_b, b_iz_b, b_in_b = split3(params["b_ih_b"])
    b_hr_f, b_hz_f, b_hn_f = split3(params["b_hh_f"])
    b_hr_b, b_hz_b, b_hn_b = split3(params["b_hh_b"])

    def proj(w):                                    # (H, E) -> (V, H)
        return jnp.dot(emb, w.T, precision=hi)

    zV = jnp.zeros((V, H), jnp.float32)
    # rows [0, V): forward-token contributions; rows [V, 2V): backward-token.
    fwd_rows = jnp.concatenate(
        [proj(w_ir_f) + b_ir_f + b_hr_f, zV,
         proj(w_iz_f) + b_iz_f + b_hz_f, zV,
         proj(w_in_f) + b_in_f,          zV], axis=1)          # (V, 6H)
    bwd_rows = jnp.concatenate(
        [zV, proj(w_ir_b) + b_ir_b + b_hr_b,
         zV, proj(w_iz_b) + b_iz_b + b_hz_b,
         zV, proj(w_in_b) + b_in_b], axis=1)                   # (V, 6H)
    table = jnp.concatenate([fwd_rows, bwd_rows], axis=0)       # (2V, 6H)
    table = jnp.pad(table, ((0, KP - 2 * V), (0, 0)))           # (KP, 6H)

    zH = jnp.zeros((H, H), jnp.float32)
    wh_top = jnp.concatenate([w_hr_f.T, zH, w_hz_f.T, zH, w_hn_f.T, zH], axis=1)
    wh_bot = jnp.concatenate([zH, w_hr_b.T, zH, w_hz_b.T, zH, w_hn_b.T], axis=1)
    w_h = jnp.concatenate([wh_top, wh_bot], axis=0)              # (2H, 6H)

    # b_hn must stay inside r * (h @ W_hn + b_hn): kept separate.
    b_hn = jnp.concatenate([b_hn_f, b_hn_b]).reshape(1, 2 * H)   # (1, 2H)

    return {"table": table, "w_h": w_h, "b_hn": b_hn, "vocab": V, "hidden": H}


# ----------------------------------------------------------------------------
# Forward pass: one Pallas kernel (fused gather + projection + recurrence).
# ----------------------------------------------------------------------------
def encoder_forward(token_seq, packed):
    table, w_h, b_hn = packed["table"], packed["w_h"], packed["b_hn"]
    V, H = packed["vocab"], packed["hidden"]
    B, T = token_seq.shape
    Bp = max(8, ((B + 7) // 8) * 8)                 # sublane-aligned batch

    # Per-call glue is int32-only and tiny: time-major ids + time-reversed ids.
    tok_tm = token_seq.T.astype(jnp.int32)                       # (T, B)
    tok_tm = jnp.pad(tok_tm, ((0, 0), (0, Bp - B)))              # (T, Bp)
    ids = jnp.stack([tok_tm, tok_tm[::-1]], axis=-1)             # (T, Bp, 2)
    ids = ids.reshape(T * Bp, 2)                                 # row = t*Bp + b

    def bigru_kernel(ids_ref, table_ref, wh_ref, bhn_ref, out_ref):
        KP = table_ref.shape[0]

        # ---- fused embedding gather + input projection (one MXU matmul) ----
        # One-hot "gather as matmul": each row picks its forward-token row
        # (table rows [0, V)) and its time-reversed backward-token row
        # (table rows [V, 2V)); foldable biases are already baked in.
        ids_f = ids_ref[:, 0:1]                                  # (T*Bp, 1)
        ids_b = ids_ref[:, 1:2] + V
        lane = lax.broadcasted_iota(jnp.int32, (T * Bp, KP), 1)
        onehot = ((lane == ids_f).astype(jnp.float32)
                  + (lane == ids_b).astype(jnp.float32))         # (T*Bp, KP)
        gates = jnp.dot(onehot, table_ref[...],
                        preferred_element_type=jnp.float32)      # (T*Bp, 6H)
        gates = gates.reshape(T, Bp, 6 * H)      # aligned (Bp, 6H) slabs per t

        w = wh_ref[...]                                          # (2H, 6H)
        bn = jnp.broadcast_to(bhn_ref[...], (Bp, 2 * H))         # hoisted bcast

        h = jnp.zeros((Bp, 2 * H), jnp.float32)                  # [h_fwd | h_bwd]
        # Fully unrolled recurrence (T static & small): one block-diagonal
        # (Bp,2H)x(2H,6H) dot per step drives BOTH directions; one sigmoid
        # over the 4H slab and one tanh over 2H per step.
        for t in range(T):
            g = gates[t]                                          # (Bp, 6H)
            hh = jnp.dot(h, w, preferred_element_type=jnp.float32)
            sig = jax.nn.sigmoid(g[:, :4 * H] + hh[:, :4 * H])    # r_f|r_b|z_f|z_b
            r = sig[:, :2 * H]
            z = sig[:, 2 * H:]
            n = jnp.tanh(g[:, 4 * H:] + r * (hh[:, 4 * H:] + bn))
            h = (1.0 - z) * n + z * h

        # torch.cat((hidden[0], hidden[1]), dim=1) is exactly the carried layout.
        out_ref[...] = h[:B, :]

    vmem = pl.BlockSpec(memory_space=pltpu.MemorySpace.VMEM)
    return pl.pallas_call(
        bigru_kernel,
        out_shape=jax.ShapeDtypeStruct((B, 2 * H), jnp.float32),
        in_specs=[vmem] * 4,
        out_specs=vmem,
        compiler_params=pltpu.CompilerParams(vmem_limit_bytes=32 * 1024 * 1024),
    )(ids, table, w_h, b_hn)


# ----------------------------------------------------------------------------
# Pure-JAX reference (lax.scan) for sanity checking the kernel.
# ----------------------------------------------------------------------------
def _reference_forward(token_seq, params, hidden_dim):
    H = hidden_dim
    hi = lax.Precision.HIGHEST
    emb = params["embedding"][token_seq]               # (B, T, E)
    B = emb.shape[0]

    def run(w_ih, w_hh, b_ih, b_hh, xs):
        w_ir, w_iz, w_in = w_ih[:H], w_ih[H:2 * H], w_ih[2 * H:]
        w_hr, w_hz, w_hn = w_hh[:H], w_hh[H:2 * H], w_hh[2 * H:]
        b_ir, b_iz, b_in = b_ih[:H], b_ih[H:2 * H], b_ih[2 * H:]
        b_hr, b_hz, b_hn = b_hh[:H], b_hh[H:2 * H], b_hh[2 * H:]

        def step(h, x_t):
            r = jax.nn.sigmoid(jnp.dot(x_t, w_ir.T, precision=hi) + b_ir
                               + jnp.dot(h, w_hr.T, precision=hi) + b_hr)
            z = jax.nn.sigmoid(jnp.dot(x_t, w_iz.T, precision=hi) + b_iz
                               + jnp.dot(h, w_hz.T, precision=hi) + b_hz)
            n = jnp.tanh(jnp.dot(x_t, w_in.T, precision=hi) + b_in
                         + r * (jnp.dot(h, w_hn.T, precision=hi) + b_hn))
            return (1.0 - z) * n + z * h, None

        h0 = jnp.zeros((B, H), jnp.float32)
        h_final, _ = lax.scan(step, h0, xs)
        return h_final

    xs_f = jnp.transpose(emb, (1, 0, 2))
    xs_b = xs_f[::-1]
    h_f = run(params["w_ih_f"], params["w_hh_f"], params["b_ih_f"], params["b_hh_f"], xs_f)
    h_b = run(params["w_ih_b"], params["w_hh_b"], params["b_ih_b"], params["b_hh_b"], xs_b)
    return jnp.concatenate([h_f, h_b], axis=1)


if __name__ == "__main__":
    INPUT_DIM = 50     # vocab size
    EMB_DIM = 16
    HIDDEN_DIM = 32
    BATCH = 2
    SEQ = 8

    key = jax.random.PRNGKey(0)
    k_params, k_tokens = jax.random.split(key)
    params = init_encoder_params(k_params, INPUT_DIM, EMB_DIM, HIDDEN_DIM)
    token_seq = jax.random.randint(k_tokens, (BATCH, SEQ), 0, INPUT_DIM, jnp.int32)

    # One-time packing (hoisted out of the per-call path).
    packed = pack_encoder_params(params, HIDDEN_DIM)

    fwd = jax.jit(lambda tok: encoder_forward(tok, packed))
    out = jax.block_until_ready(fwd(token_seq))

    ref = _reference_forward(token_seq, params, HIDDEN_DIM)
    assert out.shape == (BATCH, 2 * HIDDEN_DIM), out.shape
    err = float(jnp.max(jnp.abs(out - ref)))
    assert jnp.allclose(out, ref, atol=1e-4, rtol=1e-4), err

    print("KERNEL_OK")
</pallas_src>

<mosaic_0001>
module attributes {stable_mosaic.version = 11 : i64} {
  func.func @bigru_kernel(%arg0: memref<64x2xi32, #tpu.memory_space<vmem>>, %arg1: memref<128x192xf32, #tpu.memory_space<vmem>>, %arg2: memref<64x192xf32, #tpu.memory_space<vmem>>, %arg3: memref<1x64xf32, #tpu.memory_space<vmem>>, %arg4: memref<2x64xf32, #tpu.memory_space<vmem>>) attributes {dimension_semantics = [], scalar_prefetch = 0 : i64, scratch_operands = 0 : i64, tpu.core_type = #tpu.core_type<tc>} {
    %c0 = arith.constant 0 : index
    %c0_0 = arith.constant 0 : index
    %0 = vector.load %arg0[%c0, %c0_0] : memref<64x2xi32, #tpu.memory_space<vmem>>, vector<64x1xi32>
    %c0_1 = arith.constant 0 : index
    %c1 = arith.constant 1 : index
    %1 = vector.load %arg0[%c0_1, %c1] : memref<64x2xi32, #tpu.memory_space<vmem>>, vector<64x1xi32>
    %c50_i32 = arith.constant 50 : i32
    %2 = vector.broadcast %c50_i32 : i32 to vector<64x1xi32>
    %3 = arith.addi %1, %2 : vector<64x1xi32>
    %4 = tpu.iota {dimensions = array<i32: 1>} : vector<64x128xi32>
    %5 = vector.broadcast %0 : vector<64x1xi32> to vector<64x128xi32>
    %6 = arith.cmpi eq, %4, %5 : vector<64x128xi32>
    %7 = arith.extui %6 : vector<64x128xi1> to vector<64x128xi32>
    %8 = arith.sitofp %7 : vector<64x128xi32> to vector<64x128xf32>
    %9 = vector.broadcast %3 : vector<64x1xi32> to vector<64x128xi32>
    %10 = arith.cmpi eq, %4, %9 : vector<64x128xi32>
    %11 = arith.extui %10 : vector<64x128xi1> to vector<64x128xi32>
    %12 = arith.sitofp %11 : vector<64x128xi32> to vector<64x128xf32>
    %13 = arith.addf %8, %12 : vector<64x128xf32>
    %c0_2 = arith.constant 0 : index
    %c0_3 = arith.constant 0 : index
    %14 = vector.load %arg1[%c0_2, %c0_3] : memref<128x192xf32, #tpu.memory_space<vmem>>, vector<128x192xf32>
    %cst = arith.constant dense<0.000000e+00> : vector<64x192xf32>
    %15 = tpu.matmul %13, %14, %cst {dimension_numbers = #tpu.dot_dimension_numbers<[1], [0], [0], [1], [0, 0, 1, 1], [], []>} : vector<64x128xf32>, vector<128x192xf32>, vector<64x192xf32> -> vector<64x192xf32>
    %16 = vector.shape_cast %15 : vector<64x192xf32> to vector<8x8x192xf32>
    %c0_4 = arith.constant 0 : index
    %c0_5 = arith.constant 0 : index
    %17 = vector.load %arg2[%c0_4, %c0_5] : memref<64x192xf32, #tpu.memory_space<vmem>>, vector<64x192xf32>
    %c0_6 = arith.constant 0 : index
    %c0_7 = arith.constant 0 : index
    %18 = vector.load %arg3[%c0_6, %c0_7] : memref<1x64xf32, #tpu.memory_space<vmem>>, vector<1x64xf32>
    %19 = vector.shape_cast %18 : vector<1x64xf32> to vector<1x64xf32>
    %20 = vector.broadcast %19 : vector<1x64xf32> to vector<8x64xf32>
    %cst_8 = arith.constant 0.000000e+00 : f32
    %21 = vector.broadcast %cst_8 : f32 to vector<8x64xf32>
    %22 = vector.extract_strided_slice %16 {offsets = [0, 0, 0], sizes = [1, 8, 192], strides = [1, 1, 1]} : vector<8x8x192xf32> to vector<1x8x192xf32>
    %23 = vector.shape_cast %22 : vector<1x8x192xf32> to vector<8x192xf32>
    %cst_9 = arith.constant dense<0.000000e+00> : vector<8x192xf32>
    %24 = tpu.matmul %21, %17, %cst_9 {dimension_numbers = #tpu.dot_dimension_numbers<[1], [0], [0], [1], [0, 0, 1, 1], [], []>} : vector<8x64xf32>, vector<64x192xf32>, vector<8x192xf32> -> vector<8x192xf32>
    %25 = vector.extract_strided_slice %23 {offsets = [0, 0], sizes = [8, 128], strides = [1, 1]} : vector<8x192xf32> to vector<8x128xf32>
    %26 = vector.extract_strided_slice %24 {offsets = [0, 0], sizes = [8, 128], strides = [1, 1]} : vector<8x192xf32> to vector<8x128xf32>
    %27 = arith.addf %25, %26 : vector<8x128xf32>
    %28 = arith.negf %27 : vector<8x128xf32>
    %29 = math.exp %28 : vector<8x128xf32>
    %cst_10 = arith.constant 1.000000e+00 : f32
    %30 = vector.broadcast %cst_10 : f32 to vector<8x128xf32>
    %31 = arith.addf %30, %29 : vector<8x128xf32>
    %32 = arith.divf %30, %31 : vector<8x128xf32>
    %33 = vector.extract_strided_slice %32 {offsets = [0, 0], sizes = [8, 64], strides = [1, 1]} : vector<8x128xf32> to vector<8x64xf32>
    %34 = vector.extract_strided_slice %32 {offsets = [0, 64], sizes = [8, 64], strides = [1, 1]} : vector<8x128xf32> to vector<8x64xf32>
    %35 = vector.extract_strided_slice %23 {offsets = [0, 128], sizes = [8, 64], strides = [1, 1]} : vector<8x192xf32> to vector<8x64xf32>
    %36 = vector.extract_strided_slice %24 {offsets = [0, 128], sizes = [8, 64], strides = [1, 1]} : vector<8x192xf32> to vector<8x64xf32>
    %37 = arith.addf %36, %20 : vector<8x64xf32>
    %38 = arith.mulf %33, %37 : vector<8x64xf32>
    %39 = arith.addf %35, %38 : vector<8x64xf32>
    %40 = math.tanh %39 : vector<8x64xf32>
    %cst_11 = arith.constant 1.000000e+00 : f32
    %41 = vector.broadcast %cst_11 : f32 to vector<8x64xf32>
    %42 = arith.subf %41, %34 : vector<8x64xf32>
    %43 = arith.mulf %42, %40 : vector<8x64xf32>
    %44 = arith.mulf %34, %21 : vector<8x64xf32>
    %45 = arith.addf %43, %44 : vector<8x64xf32>
    %46 = vector.extract_strided_slice %16 {offsets = [1, 0, 0], sizes = [1, 8, 192], strides = [1, 1, 1]} : vector<8x8x192xf32> to vector<1x8x192xf32>
    %47 = vector.shape_cast %46 : vector<1x8x192xf32> to vector<8x192xf32>
    %cst_12 = arith.constant dense<0.000000e+00> : vector<8x192xf32>
    %48 = tpu.matmul %45, %17, %cst_12 {dimension_numbers = #tpu.dot_dimension_numbers<[1], [0], [0], [1], [0, 0, 1, 1], [], []>} : vector<8x64xf32>, vector<64x192xf32>, vector<8x192xf32> -> vector<8x192xf32>
    %49 = vector.extract_strided_slice %47 {offsets = [0, 0], sizes = [8, 128], strides = [1, 1]} : vector<8x192xf32> to vector<8x128xf32>
    %50 = vector.extract_strided_slice %48 {offsets = [0, 0], sizes = [8, 128], strides = [1, 1]} : vector<8x192xf32> to vector<8x128xf32>
    %51 = arith.addf %49, %50 : vector<8x128xf32>
    %52 = arith.negf %51 : vector<8x128xf32>
    %53 = math.exp %52 : vector<8x128xf32>
    %cst_13 = arith.constant 1.000000e+00 : f32
    %54 = vector.broadcast %cst_13 : f32 to vector<8x128xf32>
    %55 = arith.addf %54, %53 : vector<8x128xf32>
    %56 = arith.divf %54, %55 : vector<8x128xf32>
    %57 = vector.extract_strided_slice %56 {offsets = [0, 0], sizes = [8, 64], strides = [1, 1]} : vector<8x128xf32> to vector<8x64xf32>
    %58 = vector.extract_strided_slice %56 {offsets = [0, 64], sizes = [8, 64], strides = [1, 1]} : vector<8x128xf32> to vector<8x64xf32>
    %59 = vector.extract_strided_slice %47 {offsets = [0, 128], sizes = [8, 64], strides = [1, 1]} : vector<8x192xf32> to vector<8x64xf32>
    %60 = vector.extract_strided_slice %48 {offsets = [0, 128], sizes = [8, 64], strides = [1, 1]} : vector<8x192xf32> to vector<8x64xf32>
    %61 = arith.addf %60, %20 : vector<8x64xf32>
    %62 = arith.mulf %57, %61 : vector<8x64xf32>
    %63 = arith.addf %59, %62 : vector<8x64xf32>
    %64 = math.tanh %63 : vector<8x64xf32>
    %cst_14 = arith.constant 1.000000e+00 : f32
    %65 = vector.broadcast %cst_14 : f32 to vector<8x64xf32>
    %66 = arith.subf %65, %58 : vector<8x64xf32>
    %67 = arith.mulf %66, %64 : vector<8x64xf32>
    %68 = arith.mulf %58, %45 : vector<8x64xf32>
    %69 = arith.addf %67, %68 : vector<8x64xf32>
    %70 = vector.extract_strided_slice %16 {offsets = [2, 0, 0], sizes = [1, 8, 192], strides = [1, 1, 1]} : vector<8x8x192xf32> to vector<1x8x192xf32>
    %71 = vector.shape_cast %70 : vector<1x8x192xf32> to vector<8x192xf32>
    %cst_15 = arith.constant dense<0.000000e+00> : vector<8x192xf32>
    %72 = tpu.matmul %69, %17, %cst_15 {dimension_numbers = #tpu.dot_dimension_numbers<[1], [0], [0], [1], [0, 0, 1, 1], [], []>} : vector<8x64xf32>, vector<64x192xf32>, vector<8x192xf32> -> vector<8x192xf32>
    %73 = vector.extract_strided_slice %71 {offsets = [0, 0], sizes = [8, 128], strides = [1, 1]} : vector<8x192xf32> to vector<8x128xf32>
    %74 = vector.extract_strided_slice %72 {offsets = [0, 0], sizes = [8, 128], strides = [1, 1]} : vector<8x192xf32> to vector<8x128xf32>
    %75 = arith.addf %73, %74 : vector<8x128xf32>
    %76 = arith.negf %75 : vector<8x128xf32>
    %77 = math.exp %76 : vector<8x128xf32>
    %cst_16 = arith.constant 1.000000e+00 : f32
    %78 = vector.broadcast %cst_16 : f32 to vector<8x128xf32>
    %79 = arith.addf %78, %77 : vector<8x128xf32>
    %80 = arith.divf %78, %79 : vector<8x128xf32>
    %81 = vector.extract_strided_slice %80 {offsets = [0, 0], sizes = [8, 64], strides = [1, 1]} : vector<8x128xf32> to vector<8x64xf32>
    %82 = vector.extract_strided_slice %80 {offsets = [0, 64], sizes = [8, 64], strides = [1, 1]} : vector<8x128xf32> to vector<8x64xf32>
    %83 = vector.extract_strided_slice %71 {offsets = [0, 128], sizes = [8, 64], strides = [1, 1]} : vector<8x192xf32> to vector<8x64xf32>
    %84 = vector.extract_strided_slice %72 {offsets = [0, 128], sizes = [8, 64], strides = [1, 1]} : vector<8x192xf32> to vector<8x64xf32>
    %85 = arith.addf %84, %20 : vector<8x64xf32>
    %86 = arith.mulf %81, %85 : vector<8x64xf32>
    %87 = arith.addf %83, %86 : vector<8x64xf32>
    %88 = math.tanh %87 : vector<8x64xf32>
    %cst_17 = arith.constant 1.000000e+00 : f32
    %89 = vector.broadcast %cst_17 : f32 to vector<8x64xf32>
    %90 = arith.subf %89, %82 : vector<8x64xf32>
    %91 = arith.mulf %90, %88 : vector<8x64xf32>
    %92 = arith.mulf %82, %69 : vector<8x64xf32>
    %93 = arith.addf %91, %92 : vector<8x64xf32>
    %94 = vector.extract_strided_slice %16 {offsets = [3, 0, 0], sizes = [1, 8, 192], strides = [1, 1, 1]} : vector<8x8x192xf32> to vector<1x8x192xf32>
    %95 = vector.shape_cast %94 : vector<1x8x192xf32> to vector<8x192xf32>
    %cst_18 = arith.constant dense<0.000000e+00> : vector<8x192xf32>
    %96 = tpu.matmul %93, %17, %cst_18 {dimension_numbers = #tpu.dot_dimension_numbers<[1], [0], [0], [1], [0, 0, 1, 1], [], []>} : vector<8x64xf32>, vector<64x192xf32>, vector<8x192xf32> -> vector<8x192xf32>
    %97 = vector.extract_strided_slice %95 {offsets = [0, 0], sizes = [8, 128], strides = [1, 1]} : vector<8x192xf32> to vector<8x128xf32>
    %98 = vector.extract_strided_slice %96 {offsets = [0, 0], sizes = [8, 128], strides = [1, 1]} : vector<8x192xf32> to vector<8x128xf32>
    %99 = arith.addf %97, %98 : vector<8x128xf32>
    %100 = arith.negf %99 : vector<8x128xf32>
    %101 = math.exp %100 : vector<8x128xf32>
    %cst_19 = arith.constant 1.000000e+00 : f32
    %102 = vector.broadcast %cst_19 : f32 to vector<8x128xf32>
    %103 = arith.addf %102, %101 : vector<8x128xf32>
    %104 = arith.divf %102, %103 : vector<8x128xf32>
    %105 = vector.extract_strided_slice %104 {offsets = [0, 0], sizes = [8, 64], strides = [1, 1]} : vector<8x128xf32> to vector<8x64xf32>
    %106 = vector.extract_strided_slice %104 {offsets = [0, 64], sizes = [8, 64], strides = [1, 1]} : vector<8x128xf32> to vector<8x64xf32>
    %107 = vector.extract_strided_slice %95 {offsets = [0, 128], sizes = [8, 64], strides = [1, 1]} : vector<8x192xf32> to vector<8x64xf32>
    %108 = vector.extract_strided_slice %96 {offsets = [0, 128], sizes = [8, 64], strides = [1, 1]} : vector<8x192xf32> to vector<8x64xf32>
    %109 = arith.addf %108, %20 : vector<8x64xf32>
    %110 = arith.mulf %105, %109 : vector<8x64xf32>
    %111 = arith.addf %107, %110 : vector<8x64xf32>
    %112 = math.tanh %111 : vector<8x64xf32>
    %cst_20 = arith.constant 1.000000e+00 : f32
    %113 = vector.broadcast %cst_20 : f32 to vector<8x64xf32>
    %114 = arith.subf %113, %106 : vector<8x64xf32>
    %115 = arith.mulf %114, %112 : vector<8x64xf32>
    %116 = arith.mulf %106, %93 : vector<8x64xf32>
    %117 = arith.addf %115, %116 : vector<8x64xf32>
    %118 = vector.extract_strided_slice %16 {offsets = [4, 0, 0], sizes = [1, 8, 192], strides = [1, 1, 1]} : vector<8x8x192xf32> to vector<1x8x192xf32>
    %119 = vector.shape_cast %118 : vector<1x8x192xf32> to vector<8x192xf32>
    %cst_21 = arith.constant dense<0.000000e+00> : vector<8x192xf32>
    %120 = tpu.matmul %117, %17, %cst_21 {dimension_numbers = #tpu.dot_dimension_numbers<[1], [0], [0], [1], [0, 0, 1, 1], [], []>} : vector<8x64xf32>, vector<64x192xf32>, vector<8x192xf32> -> vector<8x192xf32>
    %121 = vector.extract_strided_slice %119 {offsets = [0, 0], sizes = [8, 128], strides = [1, 1]} : vector<8x192xf32> to vector<8x128xf32>
    %122 = vector.extract_strided_slice %120 {offsets = [0, 0], sizes = [8, 128], strides = [1, 1]} : vector<8x192xf32> to vector<8x128xf32>
    %123 = arith.addf %121, %122 : vector<8x128xf32>
    %124 = arith.negf %123 : vector<8x128xf32>
    %125 = math.exp %124 : vector<8x128xf32>
    %cst_22 = arith.constant 1.000000e+00 : f32
    %126 = vector.broadcast %cst_22 : f32 to vector<8x128xf32>
    %127 = arith.addf %126, %125 : vector<8x128xf32>
    %128 = arith.divf %126, %127 : vector<8x128xf32>
    %129 = vector.extract_strided_slice %128 {offsets = [0, 0], sizes = [8, 64], strides = [1, 1]} : vector<8x128xf32> to vector<8x64xf32>
    %130 = vector.extract_strided_slice %128 {offsets = [0, 64], sizes = [8, 64], strides = [1, 1]} : vector<8x128xf32> to vector<8x64xf32>
    %131 = vector.extract_strided_slice %119 {offsets = [0, 128], sizes = [8, 64], strides = [1, 1]} : vector<8x192xf32> to vector<8x64xf32>
    %132 = vector.extract_strided_slice %120 {offsets = [0, 128], sizes = [8, 64], strides = [1, 1]} : vector<8x192xf32> to vector<8x64xf32>
    %133 = arith.addf %132, %20 : vector<8x64xf32>
    %134 = arith.mulf %129, %133 : vector<8x64xf32>
    %135 = arith.addf %131, %134 : vector<8x64xf32>
    %136 = math.tanh %135 : vector<8x64xf32>
    %cst_23 = arith.constant 1.000000e+00 : f32
    %137 = vector.broadcast %cst_23 : f32 to vector<8x64xf32>
    %138 = arith.subf %137, %130 : vector<8x64xf32>
    %139 = arith.mulf %138, %136 : vector<8x64xf32>
    %140 = arith.mulf %130, %117 : vector<8x64xf32>
    %141 = arith.addf %139, %140 : vector<8x64xf32>
    %142 = vector.extract_strided_slice %16 {offsets = [5, 0, 0], sizes = [1, 8, 192], strides = [1, 1, 1]} : vector<8x8x192xf32> to vector<1x8x192xf32>
    %143 = vector.shape_cast %142 : vector<1x8x192xf32> to vector<8x192xf32>
    %cst_24 = arith.constant dense<0.000000e+00> : vector<8x192xf32>
    %144 = tpu.matmul %141, %17, %cst_24 {dimension_numbers = #tpu.dot_dimension_numbers<[1], [0], [0], [1], [0, 0, 1, 1], [], []>} : vector<8x64xf32>, vector<64x192xf32>, vector<8x192xf32> -> vector<8x192xf32>
    %145 = vector.extract_strided_slice %143 {offsets = [0, 0], sizes = [8, 128], strides = [1, 1]} : vector<8x192xf32> to vector<8x128xf32>
    %146 = vector.extract_strided_slice %144 {offsets = [0, 0], sizes = [8, 128], strides = [1, 1]} : vector<8x192xf32> to vector<8x128xf32>
    %147 = arith.addf %145, %146 : vector<8x128xf32>
    %148 = arith.negf %147 : vector<8x128xf32>
    %149 = math.exp %148 : vector<8x128xf32>
    %cst_25 = arith.constant 1.000000e+00 : f32
    %150 = vector.broadcast %cst_25 : f32 to vector<8x128xf32>
    %151 = arith.addf %150, %149 : vector<8x128xf32>
    %152 = arith.divf %150, %151 : vector<8x128xf32>
    %153 = vector.extract_strided_slice %152 {offsets = [0, 0], sizes = [8, 64], strides = [1, 1]} : vector<8x128xf32> to vector<8x64xf32>
    %154 = vector.extract_strided_slice %152 {offsets = [0, 64], sizes = [8, 64], strides = [1, 1]} : vector<8x128xf32> to vector<8x64xf32>
    %155 = vector.extract_strided_slice %143 {offsets = [0, 128], sizes = [8, 64], strides = [1, 1]} : vector<8x192xf32> to vector<8x64xf32>
    %156 = vector.extract_strided_slice %144 {offsets = [0, 128], sizes = [8, 64], strides = [1, 1]} : vector<8x192xf32> to vector<8x64xf32>
    %157 = arith.addf %156, %20 : vector<8x64xf32>
    %158 = arith.mulf %153, %157 : vector<8x64xf32>
    %159 = arith.addf %155, %158 : vector<8x64xf32>
    %160 = math.tanh %159 : vector<8x64xf32>
    %cst_26 = arith.constant 1.000000e+00 : f32
    %161 = vector.broadcast %cst_26 : f32 to vector<8x64xf32>
    %162 = arith.subf %161, %154 : vector<8x64xf32>
    %163 = arith.mulf %162, %160 : vector<8x64xf32>
    %164 = arith.mulf %154, %141 : vector<8x64xf32>
    %165 = arith.addf %163, %164 : vector<8x64xf32>
    %166 = vector.extract_strided_slice %16 {offsets = [6, 0, 0], sizes = [1, 8, 192], strides = [1, 1, 1]} : vector<8x8x192xf32> to vector<1x8x192xf32>
    %167 = vector.shape_cast %166 : vector<1x8x192xf32> to vector<8x192xf32>
    %cst_27 = arith.constant dense<0.000000e+00> : vector<8x192xf32>
    %168 = tpu.matmul %165, %17, %cst_27 {dimension_numbers = #tpu.dot_dimension_numbers<[1], [0], [0], [1], [0, 0, 1, 1], [], []>} : vector<8x64xf32>, vector<64x192xf32>, vector<8x192xf32> -> vector<8x192xf32>
    %169 = vector.extract_strided_slice %167 {offsets = [0, 0], sizes = [8, 128], strides = [1, 1]} : vector<8x192xf32> to vector<8x128xf32>
    %170 = vector.extract_strided_slice %168 {offsets = [0, 0], sizes = [8, 128], strides = [1, 1]} : vector<8x192xf32> to vector<8x128xf32>
    %171 = arith.addf %169, %170 : vector<8x128xf32>
    %172 = arith.negf %171 : vector<8x128xf32>
    %173 = math.exp %172 : vector<8x128xf32>
    %cst_28 = arith.constant 1.000000e+00 : f32
    %174 = vector.broadcast %cst_28 : f32 to vector<8x128xf32>
    %175 = arith.addf %174, %173 : vector<8x128xf32>
    %176 = arith.divf %174, %175 : vector<8x128xf32>
    %177 = vector.extract_strided_slice %176 {offsets = [0, 0], sizes = [8, 64], strides = [1, 1]} : vector<8x128xf32> to vector<8x64xf32>
    %178 = vector.extract_strided_slice %176 {offsets = [0, 64], sizes = [8, 64], strides = [1, 1]} : vector<8x128xf32> to vector<8x64xf32>
    %179 = vector.extract_strided_slice %167 {offsets = [0, 128], sizes = [8, 64], strides = [1, 1]} : vector<8x192xf32> to vector<8x64xf32>
    %180 = vector.extract_strided_slice %168 {offsets = [0, 128], sizes = [8, 64], strides = [1, 1]} : vector<8x192xf32> to vector<8x64xf32>
    %181 = arith.addf %180, %20 : vector<8x64xf32>
    %182 = arith.mulf %177, %181 : vector<8x64xf32>
    %183 = arith.addf %179, %182 : vector<8x64xf32>
    %184 = math.tanh %183 : vector<8x64xf32>
    %cst_29 = arith.constant 1.000000e+00 : f32
    %185 = vector.broadcast %cst_29 : f32 to vector<8x64xf32>
    %186 = arith.subf %185, %178 : vector<8x64xf32>
    %187 = arith.mulf %186, %184 : vector<8x64xf32>
    %188 = arith.mulf %178, %165 : vector<8x64xf32>
    %189 = arith.addf %187, %188 : vector<8x64xf32>
    %190 = vector.extract_strided_slice %16 {offsets = [7, 0, 0], sizes = [1, 8, 192], strides = [1, 1, 1]} : vector<8x8x192xf32> to vector<1x8x192xf32>
    %191 = vector.shape_cast %190 : vector<1x8x192xf32> to vector<8x192xf32>
    %cst_30 = arith.constant dense<0.000000e+00> : vector<8x192xf32>
    %192 = tpu.matmul %189, %17, %cst_30 {dimension_numbers = #tpu.dot_dimension_numbers<[1], [0], [0], [1], [0, 0, 1, 1], [], []>} : vector<8x64xf32>, vector<64x192xf32>, vector<8x192xf32> -> vector<8x192xf32>
    %193 = vector.extract_strided_slice %191 {offsets = [0, 0], sizes = [8, 128], strides = [1, 1]} : vector<8x192xf32> to vector<8x128xf32>
    %194 = vector.extract_strided_slice %192 {offsets = [0, 0], sizes = [8, 128], strides = [1, 1]} : vector<8x192xf32> to vector<8x128xf32>
    %195 = arith.addf %193, %194 : vector<8x128xf32>
    %196 = arith.negf %195 : vector<8x128xf32>
    %197 = math.exp %196 : vector<8x128xf32>
    %cst_31 = arith.constant 1.000000e+00 : f32
    %198 = vector.broadcast %cst_31 : f32 to vector<8x128xf32>
    %199 = arith.addf %198, %197 : vector<8x128xf32>
    %200 = arith.divf %198, %199 : vector<8x128xf32>
    %201 = vector.extract_strided_slice %200 {offsets = [0, 0], sizes = [8, 64], strides = [1, 1]} : vector<8x128xf32> to vector<8x64xf32>
    %202 = vector.extract_strided_slice %200 {offsets = [0, 64], sizes = [8, 64], strides = [1, 1]} : vector<8x128xf32> to vector<8x64xf32>
    %203 = vector.extract_strided_slice %191 {offsets = [0, 128], sizes = [8, 64], strides = [1, 1]} : vector<8x192xf32> to vector<8x64xf32>
    %204 = vector.extract_strided_slice %192 {offsets = [0, 128], sizes = [8, 64], strides = [1, 1]} : vector<8x192xf32> to vector<8x64xf32>
    %205 = arith.addf %204, %20 : vector<8x64xf32>
    %206 = arith.mulf %201, %205 : vector<8x64xf32>
    %207 = arith.addf %203, %206 : vector<8x64xf32>
    %208 = math.tanh %207 : vector<8x64xf32>
    %cst_32 = arith.constant 1.000000e+00 : f32
    %209 = vector.broadcast %cst_32 : f32 to vector<8x64xf32>
    %210 = arith.subf %209, %202 : vector<8x64xf32>
    %211 = arith.mulf %210, %208 : vector<8x64xf32>
    %212 = arith.mulf %202, %189 : vector<8x64xf32>
    %213 = arith.addf %211, %212 : vector<8x64xf32>
    %214 = vector.extract_strided_slice %213 {offsets = [0, 0], sizes = [2, 64], strides = [1, 1]} : vector<8x64xf32> to vector<2x64xf32>
    %c0_33 = arith.constant 0 : index
    %c0_34 = arith.constant 0 : index
    %215 = vector.load %arg4[%c0_33, %c0_34] : memref<2x64xf32, #tpu.memory_space<vmem>>, vector<2x64xf32>
    tpu.vector_store %arg4[%c0_33, %c0_34], %214 {strides = array<i32>} : memref<2x64xf32, #tpu.memory_space<vmem>>, vector<2x64xf32>,
    return
  }
}

</mosaic_0001>

<bundles_post_ra>
// kernel: _lambda_.1
= control target key start
LH: loop header
LB: loop body
LE: loop exit
PB: predicated region body
PF: predicated region fallthrough
CT: control target
= control target key end

     0   :  { %9 = vsyncpa [#allocation3], 0  ;;  %s1642_s0 = inlined_call_operand.vmem [shape: s32[64,2], index: 0, kind: input, shape index: {}]   ;;  %s1643_s1 = inlined_call_operand.hbm [shape: f32[128,192], index: 1, kind: input, shape index: {}]   ;;  %s1644_s2 = inlined_call_operand.vmem [shape: f32[64,192], index: 2, kind: input, shape index: {}]   ;;  %s1645_s3 = inlined_call_operand.vmem [shape: f32[1,64], index: 3, kind: input, shape index: {}]   ;;  %s1646_s4 = inlined_call_operand.hbm [shape: f32[2,64], index: 4, kind: output, shape index: {}]  }
   0x1   :  { %10 = vsyncpa [#allocation4], 0  ;;  %s1246_s15 = smov [#allocation2]  }
   0x2   :  { %s18_s16 = sshll.u32 %s1246_s15, 4  ;;  %s19_s16 = int_to_ptr.vmem [resolvable:$true] %s18_s16 }
   0x3   :  { %s1210_s17 = scalar_lea.vmem %s19_s16, 4096  ;;  %p1215_p1 = scmp.lt.s32.totalorder %s19_s16, %s19_s16 }
   0x4   :  { %p1211_p0 = scmp.ne.s32.totalorder %s19_s16, %s1210_s17  ;;  %p1216_p2 = scmp.lt.s32.totalorder %s1210_s17, %s1210_s17 }
   0x6   :  { %p1217_p3 = por %p1216_p2, %p1215_p1 }
   0x8   :  { %p1218_p4 = pnand %p1217_p3, %p1211_p0 }
   0xa   :  { %1221 = shalt.err (!%p1218_p4)
}
   0xb   :  { %s1247_s18 = smov 256   ;;  %s1248_s19 = smov 16  }
   0xc   :  { %24 = dma.hbm_to_vmem [thread:$0]  %s1643_s1, 4096, %s19_s16, [#allocation3], %s1247_s18, %s1247_s18, %s1248_s19  }
   0xd   :  { %1242 = dma.done.wait [#allocation3], 4096  }
   0xe   :  { %1243 = vsyncadd [#allocation3], 4294963200  ;;  %v1249_v0 = vmov 0   ;;  %v1250_v1 = vmov 0.0   ;;  %v32_v2 = vld [vmem:[%s1642_s0] sm:$0xff]  ;;  %v185_v3 = vld [vmem:[#allocation2 + $0xf8] sm:$0xff]  ;;  %v48_v53 = vlaneseq }
   0xf   :  { %1142 = vset.pattern.permute.xlu0 %v1249_v0  ;;  %390 = vmatprep.mubr.f32.mxu1 %v1250_v1  ;;  %v184_v4 = vld [vmem:[#allocation2 + $0xf0] sm:$0xff]  ;;  %v183_v5 = vld [vmem:[#allocation2 + $0xe8] sm:$0xff]  ;;  %v182_v6 = vld [vmem:[#allocation2 + $0xe0] sm:$0xff]  ;;  %v40_v7 = vadd.s32 50, %v32_v2  ;;  %v1251_v11 = vmov 1   ;;  %s1252_s29 = smov 64  }
  0x10   :  { %250 = vmatprep.mubr.f32.mxu0 %v1250_v1  ;;  %1144 = vset.pattern.permute.xlu1 %v1249_v0  ;;  %v181_v8 = vld [vmem:[#allocation2 + $0xd8] sm:$0xff]  ;;  %v180_v9 = vld [vmem:[#allocation2 + $0xd0] sm:$0xff]  ;;  %v179_v10 = vld [vmem:[#allocation2 + $0xc8] sm:$0xff]  ;;  %v1407_v54 = vand.u32 127, %v48_v53  ;;  %vm322_vm4 = vcmask 523264  }
  0x11   :  { %51 = vperm.xlu0 %1142, %v32_v2   ;;  %186 = vmatprep.subr.mxu0 %v185_v3  ;;  %v178_v12 = vld [vmem:[#allocation2 + $0xc0] sm:$0xff]  ;;  %v1293_v13 = vld [vmem:[%s1644_s2 + $0x78] sm:$0xff]  ;;  %v1298_v15 = vld [vmem:[%s1644_s2 + $0x70] sm:$0xff] }
  0x12   :  { %187 = vmatpush1.msra.mxu0 %v184_v4  ;;  %v177_v14 = vld [vmem:[#allocation2 + $0xb8] sm:$0xff]  ;;  %v1303_v16 = vld [vmem:[%s1644_s2 + $0x68] sm:$0xff]  ;;  %v176_v17 = vld [vmem:[#allocation2 + $0xb0] sm:$0xff]  ;;  %342 = vmatprep.subr.mxu1 %v1293_v13 }
  0x13   :  { %188 = vmatprep.subr.mxu0 %v183_v5  ;;  %v1309_v18 = vld [vmem:[%s1644_s2 + $0x60] sm:$0xff]  ;;  %v175_v19 = vld [vmem:[#allocation2 + $0xa8] sm:$0xff]  ;;  %343 = vmatpush1.msra.mxu1 %v1298_v15  ;;  %v1315_v20 = vld [vmem:[%s1644_s2 + $0x58] sm:$0xff] }
  0x14   :  { %189 = vmatpush1.msra.mxu0 %v182_v6  ;;  %v174_v21 = vld [vmem:[#allocation2 + $0xa0] sm:$0xff]  ;;  %344 = vmatprep.subr.mxu1 %v1303_v16  ;;  %v1321_v22 = vld [vmem:[%s1644_s2 + $0x50] sm:$0xff]  ;;  %v173_v23 = vld [vmem:[#allocation2 + $0x98] sm:$0xff] }
  0x15   :  { %1143 = vset.pattern.permute.xlu0 %v1251_v11  ;;  %190 = vmatprep.subr.mxu0 %v181_v8  ;;  %v1327_v24 = vld [vmem:[%s1644_s2 + $0x48] sm:$0xff]  ;;  %v172_v25 = vld [vmem:[#allocation2 + $0x90] sm:$0xff]  ;;  %v1333_v26 = vld [vmem:[%s1644_s2 + $0x40] sm:$0xff] }
  0x16   :  { %99 = vperm.xlu0 %1143, %v40_v7   ;;  %191 = vmatpush1.msra.mxu0 %v180_v9  ;;  %v171_v27 = vld [vmem:[#allocation2 + $0x88] sm:$0xff]  ;;  %v1339_v28 = vld [vmem:[%s1644_s2 + $0x38] sm:$0xff]  ;;  %v170_v29 = vld [vmem:[#allocation2 + $0x80] sm:$0xff] }
  0x17   :  { %192 = vmatprep.subr.mxu0 %v179_v10  ;;  %345 = vmatpush1.msra.mxu1 %v1309_v18  ;;  %v1345_v30 = vld [vmem:[%s1644_s2 + $0x30] sm:$0xff]  ;;  %v169_v31 = vld [vmem:[#allocation2 + $0x78] sm:$0xff]  ;;  %v1351_v32 = vld [vmem:[%s1644_s2 + $0x28] sm:$0xff] }
  0x18   :  { %193 = vmatpush1.msra.mxu0 %v178_v12  ;;  %346 = vmatprep.subr.mxu1 %v1315_v20  ;;  %v168_v33 = vld [vmem:[#allocation2 + $0x70] sm:$0xff]  ;;  %v1357_v34 = vld [vmem:[%s1644_s2 + $0x20] sm:$0xff]  ;;  %v167_v35 = vld [vmem:[#allocation2 + $0x68] sm:$0xff] }
  0x19   :  { %194 = vmatprep.subr.mxu0 %v177_v14  ;;  %347 = vmatpush1.msra.mxu1 %v1321_v22  ;;  %v1363_v36 = vld [vmem:[%s1644_s2 + $0x18] sm:$0xff]  ;;  %v166_v37 = vld [vmem:[#allocation2 + $0x60] sm:$0xff]  ;;  %v1369_v38 = vld [vmem:[%s1644_s2 + $0x10] sm:$0xff] }
  0x1a   :  { %195 = vmatpush1.msra.mxu0 %v176_v17  ;;  %348 = vmatprep.subr.mxu1 %v1327_v24  ;;  %v165_v39 = vld [vmem:[#allocation2 + $0x58] sm:$0xff]  ;;  %v1375_v40 = vld [vmem:[%s1644_s2 + $0x8] sm:$0xff]  ;;  %v164_v41 = vld [vmem:[#allocation2 + $0x50] sm:$0xff] }
  0x1b   :  { %196 = vmatprep.subr.mxu0 %v175_v19  ;;  %349 = vmatpush1.msra.mxu1 %v1333_v26  ;;  %v1381_v42 = vld [vmem:[%s1644_s2] sm:$0xff]  ;;  %v163_v43 = vld [vmem:[#allocation2 + $0x48] sm:$0xff]  ;;  %v161_v45 = vld [vmem:[#allocation2 + $0x38] sm:$0xff] }
  0x1c   :  { %197 = vmatpush1.msra.mxu0 %v174_v21  ;;  %350 = vmatprep.subr.mxu1 %v1339_v28  ;;  %v162_v44 = vld [vmem:[#allocation2 + $0x40] sm:$0xff]  ;;  %v160_v46 = vld [vmem:[#allocation2 + $0x30] sm:$0xff]  ;;  %v159_v47 = vld [vmem:[#allocation2 + $0x28] sm:$0xff] }
  0x1d   :  { %198 = vmatprep.subr.mxu0 %v173_v23  ;;  %351 = vmatpush1.msra.mxu1 %v1345_v30  ;;  %v158_v48 = vld [vmem:[#allocation2 + $0x20] sm:$0xff]  ;;  %v157_v49 = vld [vmem:[#allocation2 + $0x18] sm:$0xff]  ;;  %v156_v50 = vld [vmem:[#allocation2 + $0x10] sm:$0xff] }
  0x1e   :  { %199 = vmatpush1.msra.mxu0 %v172_v25  ;;  %352 = vmatprep.subr.mxu1 %v1351_v32  ;;  %v155_v51 = vld [vmem:[#allocation2 + $0x8] sm:$0xff]  ;;  %v154_v52 = vld [vmem:[#allocation2] sm:$0xff] }
  0x1f   :  { %200 = vmatprep.subr.mxu0 %v171_v27  ;;  %353 = vmatpush1.msra.mxu1 %v1357_v34  ;;  %v1433_v4 = vld [vmem:[%s1645_s3] ss:$0 sm:$0xff]  ;;  %v33_v14 = vld [vmem:[%s1642_s0 + $0x8] sm:$0xff] }
  0x20   :  { %201 = vmatpush1.msra.mxu0 %v170_v29  ;;  %354 = vmatprep.subr.mxu1 %v1363_v36  ;;  %v41_v17 = vadd.s32 50, %v33_v14 }
  0x21   :  { %202 = vmatprep.subr.mxu0 %v169_v31  ;;  %355 = vmatpush1.msra.mxu1 %v1369_v38 }
  0x22   :  { %203 = vmatpush1.msra.mxu0 %v168_v33  ;;  %356 = vmatprep.subr.mxu1 %v1375_v40 }
  0x23   :  { %204 = vmatprep.subr.mxu0 %v167_v35  ;;  %357 = vmatpush1.msra.mxu1 %v1381_v42 }
  0x24   :  { %205 = vmatpush1.msra.mxu0 %v166_v37  ;;  %391 = vmatmul.mubr.f32.vlgmr.msra.gmra.mxu1 %v1250_v1 }
  0x25   :  { %206 = vmatprep.subr.mxu0 %v165_v39  ;;  %437 = vmatprep.subr.mxu1 %v1293_v13 }
  0x26   :  { %207 = vmatpush1.msra.mxu0 %v164_v41  ;;  %438 = vmatpush1.msra.mxu1 %v1298_v15  ;;  %v34_v41 = vld [vmem:[%s1642_s0 + $0x10] sm:$0xff] }
  0x27   :  { %208 = vmatprep.subr.mxu0 %v163_v43  ;;  %439 = vmatprep.subr.mxu1 %v1303_v16 }
  0x28   :  { %209 = vmatpush1.msra.mxu0 %v162_v44  ;;  %440 = vmatpush1.msra.mxu1 %v1309_v18 }
  0x29   :  { %210 = vmatprep.subr.mxu0 %v161_v45  ;;  %441 = vmatprep.subr.mxu1 %v1315_v20 }
  0x2a   :  { %211 = vmatpush1.msra.mxu0 %v160_v46  ;;  %442 = vmatpush1.msra.mxu1 %v1321_v22 }
  0x2b   :  { %212 = vmatprep.subr.mxu0 %v159_v47  ;;  %443 = vmatprep.subr.mxu1 %v1327_v24 }
  0x2c   :  { %213 = vmatpush1.msra.mxu0 %v158_v48  ;;  %444 = vmatpush1.msra.mxu1 %v1333_v26 }
  0x2d   :  { %214 = vmatprep.subr.mxu0 %v157_v49  ;;  %445 = vmatprep.subr.mxu1 %v1339_v28 }
  0x2e   :  { %215 = vmatpush1.msra.mxu0 %v156_v50  ;;  %446 = vmatpush1.msra.mxu1 %v1345_v30 }
  0x2f   :  { %216 = vmatprep.subr.mxu0 %v155_v51  ;;  %485 = vmatprep.mubr.f32.mxu1 %v1250_v1 }
  0x30   :  { %217 = vmatpush1.msra.mxu0 %v154_v52  ;;  %447 = vmatprep.subr.mxu1 %v1351_v32 }
  0x31   :  { %1146 = vset.pattern.permute.xlu0 %v1249_v0  ;;  %448 = vmatpush1.msra.mxu1 %v1357_v34 }
  0x32   :  { %627 = vmatprep.subr.mxu0 %v1293_v13  ;;  %449 = vmatprep.subr.mxu1 %v1363_v36 }
  0x33   :  { %450 = vmatpush1.msra.mxu1 %v1369_v38 }
  0x34   :  { %451 = vmatprep.subr.mxu1 %v1375_v40 }
  0x35   :  { %452 = vmatpush1.msra.mxu1 %v1381_v42 }
  0x36   :  { %532 = vmatprep.subr.mxu1 %v1293_v13 }
  0x8c   :  { %v52_v55 = vpop.permute.xlu0 %51 }
  0x8d   :  { %vm74_vm0 = vcmp.eq.s32.totalorder %v1407_v54, %v52_v55 }
  0x8e   :  { %v1102_v57 = vsel %vm74_vm0, 1.0, %v1250_v1 }
  0x91   :  { %v100_v56 = vpop.permute.xlu0 %99 }
  0x92   :  { %vm122_vm1 = vcmp.eq.s32.totalorder %v1407_v54, %v100_v56 }
  0x93   :  { %v1110_v58 = vsel %vm122_vm1, 1.0, %v1250_v1  ;;  %vm1085_vm1 = vcmask 517120  }
  0x94   :  { %v146_v59 = vadd.f32 %v1110_v58, %v1102_v57  ;;  %v42_v57 = vadd.s32 50, %v34_v41 }
  0x96   :  { %251 = vmatmul.mubr.f32.vlgmr.msra.gmra.mxu0 %v146_v59 }
  0x97   :  { %256 = vmatprep.mubr.f32.mxu0 %v1250_v1  ;;  %628 = vmatpush1.msra.mxu0 %v1298_v15 }
  0x98   :  { %629 = vmatprep.subr.mxu0 %v1303_v16 }
  0x99   :  { %630 = vmatpush1.msra.mxu0 %v1309_v18 }
  0x9a   :  { %631 = vmatprep.subr.mxu0 %v1315_v20 }
  0x9b   :  { %632 = vmatpush1.msra.mxu0 %v1321_v22 }
  0x9c   :  { %633 = vmatprep.subr.mxu0 %v1327_v24 }
  0x9d   :  { %634 = vmatpush1.msra.mxu0 %v1333_v26 }
  0x9e   :  { %635 = vmatprep.subr.mxu0 %v1339_v28 }
  0x9f   :  { %636 = vmatpush1.msra.mxu0 %v1345_v30 }
  0xa0   :  { %637 = vmatprep.subr.mxu0 %v1351_v32 }
  0xa1   :  { %638 = vmatpush1.msra.mxu0 %v1357_v34 }
  0xa2   :  { %639 = vmatprep.subr.mxu0 %v1363_v36 }
  0xa3   :  { %640 = vmatpush1.msra.mxu0 %v1369_v38 }
  0xa4   :  { %641 = vmatprep.subr.mxu0 %v1375_v40 }
  0xa5   :  { %642 = vmatpush1.msra.mxu0 %v1381_v42 }
  0xa6   :  { %817 = vmatprep.subr.mxu0 %v1293_v13 }
  0xe4   :  { %v392_v60 = vpop.f32.mrf.mxu1 }
  0xe6   :  { %v394_v5 = vpop.f32.mrf.mxu1 }
  0xe7   :  { %v404_v6 = vadd.f32 %v1433_v4, %v394_v5 }
 0x156   :  { %v252_v61 = vpop.f32.mrf.mxu0 }
 0x157   :  { %v397_v62 = vadd.f32 %v392_v60, %v252_v61 }
 0x158   :  { %v254_v9 = vpop.f32.mrf.mxu0 }
 0x159   :  { %v1119_v63 = vmul.f32 -1.442695, %v397_v62 }
 0x15b   :  { %1154 = vpow2.f32 %v1119_v63 }
 0x168   :  { %v1155_v2 = vpop.eup %1154 }
 0x169   :  { %v401_v3 = vadd.f32 1.0, %v1155_v2 }
 0x16b   :  { %1156 = vrcp.f32 %v401_v3 }
 0x178   :  { %v1157_v7 = vpop.eup %1156 }
 0x179   :  { %v405_v8 = vmul.f32 %v1157_v7, %v404_v6  ;;  %v408_v19 = vsub.f32 1.0, %v1157_v7  ;;  %v414_v23 = vmul.f32 0.0, %v1157_v7 }
 0x17b   :  { %v406_v10 = vadd.f32 %v405_v8, %v254_v9  ;;  %v35_v8 = vld [vmem:[%s1642_s0 + $0x18] sm:$0xff]  ;;  %v36_v9 = vld [vmem:[%s1642_s0 + $0x20] sm:$0xff] }
 0x17d   :  { %1158 = vtanh.f32 %v406_v10  ;;  %v44_v10 = vadd.s32 50, %v36_v9 }
 0x18a   :  { %v1159_v12 = vpop.eup %1158 }
 0x18b   :  { %410 = vrot.lane.b32.xlu1 %v1159_v12, %s1252_s29  ;;  %v37_v12 = vld [vmem:[%s1642_s0 + $0x28] sm:$0xff] }
 0x18f   :  { %54 = vperm.xlu1 %1144, %v33_v14   ;;  %v45_v14 = vadd.s32 50, %v37_v12 }
 0x193   :  { %1145 = vset.pattern.permute.xlu1 %v1251_v11 }
 0x194   :  { %102 = vperm.xlu1 %1145, %v41_v17   ;;  %v38_v17 = vld [vmem:[%s1642_s0 + $0x30] sm:$0xff] }
 0x1fd   :  { %v411_v21 = vpop.permute.xlu1 %410 }
 0x1fe   :  { %v413_v25 = vmul.f32 %v411_v21, %v408_v19  ;;  %v39_v19 = vld [vmem:[%s1642_s0 + $0x38] sm:$0xff]  ;;  %s1253_s0 = smov [#allocation5]  }
 0x1ff   :  { %v47_v21 = vadd.s32 50, %v39_v19  ;;  %s1093_s17 = sshll.u32 %s1253_s0, 4  ;;  %s1094_s17 = int_to_ptr.vmem [resolvable:$true] %s1093_s17 }
 0x200   :  { %v415_v27 = vadd.f32 %v414_v23, %v413_v25  ;;  %s1222_s18 = scalar_lea.vmem %s1094_s17, 32  ;;  %p1227_p6 = scmp.lt.s32.totalorder %s1094_s17, %s1094_s17 }
 0x201   :  { %p1223_p5 = scmp.ne.s32.totalorder %s1094_s17, %s1222_s18  ;;  %p1228_p7 = scmp.lt.s32.totalorder %s1222_s18, %s1222_s18 }
 0x202   :  { %417 = vrot.lane.b32.xlu0 %v415_v27, %s1252_s29 }
 0x203   :  { %p1229_p8 = por %p1228_p7, %p1227_p6 }
 0x205   :  { %p1230_p9 = pnand %p1229_p8, %p1223_p5 }
 0x206   :  { %57 = vperm.xlu0 %1146, %v34_v41  }
 0x20a   :  { %v55_v29 = vpop.permute.xlu1 %54  ;;  %1148 = vset.pattern.permute.xlu0 %v1251_v11 }
 0x20b   :  { %vm75_vm2 = vcmp.eq.s32.totalorder %v1407_v54, %v55_v29 }
 0x20c   :  { %v1103_v31 = vsel %vm75_vm2, 1.0, %v1250_v1 }
 0x20f   :  { %v103_v33 = vpop.permute.xlu1 %102 }
 0x210   :  { %vm123_vm3 = vcmp.eq.s32.totalorder %v1407_v54, %v103_v33 }
 0x211   :  { %v1111_v35 = vsel %vm123_vm3, 1.0, %v1250_v1 }
 0x212   :  { %v147_v37 = vadd.f32 %v1111_v35, %v1103_v31 }
 0x214   :  { %257 = vmatmul.mubr.f32.gmra.mxu0 %v147_v37 }
 0x215   :  { %262 = vmatprep.mubr.f32.mxu0 %v1250_v1 }
 0x274   :  { %v418_v39 = vpop.permute.xlu0 %417 }
 0x275   :  { %1120 = vmatmul.mubr.msk.f32.vlgmr.msra.gmra.mxu1 %vm322_vm4, %v418_v39 }
 0x276   :  { %533 = vmatpush1.msra.mxu1 %v1298_v15  ;;  %580 = vmatprep.mubr.f32.mxu1 %v1250_v1 }
 0x277   :  { %534 = vmatprep.subr.mxu1 %v1303_v16 }
 0x278   :  { %535 = vmatpush1.msra.mxu1 %v1309_v18 }
 0x279   :  { %536 = vmatprep.subr.mxu1 %v1315_v20 }
 0x27a   :  { %537 = vmatpush1.msra.mxu1 %v1321_v22 }
 0x27b   :  { %538 = vmatprep.subr.mxu1 %v1327_v24 }
 0x27c   :  { %539 = vmatpush1.msra.mxu1 %v1333_v26 }
 0x27d   :  { %540 = vmatprep.subr.mxu1 %v1339_v28 }
 0x27e   :  { %541 = vmatpush1.msra.mxu1 %v1345_v30 }
 0x27f   :  { %542 = vmatprep.subr.mxu1 %v1351_v32 }
 0x280   :  { %543 = vmatpush1.msra.mxu1 %v1357_v34 }
 0x281   :  { %544 = vmatprep.subr.mxu1 %v1363_v36  ;;  %v58_v63 = vpop.permute.xlu0 %57 }
 0x282   :  { %545 = vmatpush1.msra.mxu1 %v1369_v38  ;;  %vm76_vm5 = vcmp.eq.s32.totalorder %v1407_v54, %v58_v63 }
 0x283   :  { %546 = vmatprep.subr.mxu1 %v1375_v40  ;;  %v1104_v2 = vsel %vm76_vm5, 1.0, %v1250_v1 }
 0x284   :  { %547 = vmatpush1.msra.mxu1 %v1381_v42 }
 0x285   :  { %722 = vmatprep.subr.mxu1 %v1293_v13 }
 0x2d4   :  { %v258_v43 = vpop.f32.mrf.mxu0 }
 0x2d6   :  { %v260_v53 = vpop.f32.mrf.mxu0 }
 0x335   :  { %v487_v44 = vpop.f32.mrf.mxu1 }
 0x336   :  { %v492_v45 = vadd.f32 %v487_v44, %v258_v43 }
 0x337   :  { %v489_v49 = vpop.f32.mrf.mxu1 }
 0x338   :  { %v1121_v46 = vmul.f32 -1.442695, %v492_v45  ;;  %v499_v50 = vadd.f32 %v1433_v4, %v489_v49 }
 0x33a   :  { %1160 = vpow2.f32 %v1121_v46  ;;  %v43_v46 = vadd.s32 50, %v35_v8 }
 0x347   :  { %v1161_v47 = vpop.eup %1160 }
 0x348   :  { %v496_v48 = vadd.f32 1.0, %v1161_v47  ;;  %v46_v47 = vadd.s32 50, %v38_v17 }
 0x34a   :  { %1162 = vrcp.f32 %v496_v48 }
 0x357   :  { %v1163_v51 = vpop.eup %1162 }
 0x358   :  { %v500_v52 = vmul.f32 %v1163_v51, %v499_v50  ;;  %v503_v58 = vsub.f32 1.0, %v1163_v51  ;;  %v509_v60 = vmul.f32 %v1163_v51, %v415_v27 }
 0x35a   :  { %v501_v55 = vadd.f32 %v500_v52, %v260_v53 }
 0x35c   :  { %1164 = vtanh.f32 %v501_v55 }
 0x369   :  { %v1165_v56 = vpop.eup %1164 }
 0x36a   :  { %505 = vrot.lane.b32.xlu1 %v1165_v56, %s1252_s29 }
 0x36e   :  { %105 = vperm.xlu1 %1145, %v42_v57  }
 0x372   :  { %1147 = vset.pattern.permute.xlu1 %v1249_v0 }
 0x3dc   :  { %v506_v59 = vpop.permute.xlu1 %505 }
 0x3dd   :  { %v508_v61 = vmul.f32 %v506_v59, %v503_v58 }
 0x3df   :  { %v1472_v62 = vadd.f32 %v509_v60, %v508_v61 }
 0x3e1   :  { %512 = vrot.lane.b32.xlu1 %v1472_v62, %s1252_s29 }
 0x3e5   :  { %60 = vperm.xlu1 %1147, %v35_v8  }
 0x3e9   :  { %v106_v3 = vpop.permute.xlu1 %105  ;;  %63 = vperm.xlu1 %1147, %v36_v9  }
 0x3ea   :  { %vm124_vm6 = vcmp.eq.s32.totalorder %v1407_v54, %v106_v3 }
 0x3eb   :  { %v1112_v5 = vsel %vm124_vm6, 1.0, %v1250_v1 }
 0x3ec   :  { %v148_v6 = vadd.f32 %v1112_v5, %v1104_v2 }
 0x3ed   :  { %1149 = vset.pattern.permute.xlu1 %v1251_v11 }
 0x3ee   :  { %263 = vmatmul.mubr.f32.gmra.mxu0 %v148_v6  ;;  %111 = vperm.xlu1 %1149, %v44_v10  }
 0x3ef   :  { %268 = vmatprep.mubr.f32.mxu0 %v1250_v1 }
 0x3f2   :  { %114 = vperm.xlu1 %1149, %v45_v14  }
 0x3f6   :  { %1151 = vset.pattern.permute.xlu1 %v1249_v0 }
 0x3f7   :  { %69 = vperm.xlu1 %1151, %v38_v17  }
 0x3fb   :  { %72 = vperm.xlu1 %1151, %v39_v19  }
 0x3ff   :  { %1153 = vset.pattern.permute.xlu1 %v1251_v11 }
 0x400   :  { %120 = vperm.xlu1 %1153, %v47_v21  }
 0x453   :  { %v513_v7 = vpop.permute.xlu1 %512 }
 0x454   :  { %1122 = vmatmul.mubr.msk.f32.vlgmr.msra.gmra.mxu1 %vm322_vm4, %v513_v7 }
 0x455   :  { %723 = vmatpush1.msra.mxu1 %v1298_v15  ;;  %770 = vmatprep.mubr.f32.mxu1 %v1250_v1 }
 0x456   :  { %724 = vmatprep.subr.mxu1 %v1303_v16 }
 0x457   :  { %725 = vmatpush1.msra.mxu1 %v1309_v18 }
 0x458   :  { %726 = vmatprep.subr.mxu1 %v1315_v20 }
 0x459   :  { %727 = vmatpush1.msra.mxu1 %v1321_v22 }
 0x45a   :  { %728 = vmatprep.subr.mxu1 %v1327_v24 }
 0x45b   :  { %729 = vmatpush1.msra.mxu1 %v1333_v26 }
 0x45c   :  { %730 = vmatprep.subr.mxu1 %v1339_v28 }
 0x45d   :  { %731 = vmatpush1.msra.mxu1 %v1345_v30 }
 0x45e   :  { %732 = vmatprep.subr.mxu1 %v1351_v32 }
 0x45f   :  { %733 = vmatpush1.msra.mxu1 %v1357_v34 }
 0x460   :  { %734 = vmatprep.subr.mxu1 %v1363_v36  ;;  %v61_v48 = vpop.permute.xlu1 %60 }
 0x461   :  { %735 = vmatpush1.msra.mxu1 %v1369_v38  ;;  %vm77_vm7 = vcmp.eq.s32.totalorder %v1407_v54, %v61_v48 }
 0x462   :  { %736 = vmatprep.subr.mxu1 %v1375_v40 }
 0x463   :  { %737 = vmatpush1.msra.mxu1 %v1381_v42 }
 0x464   :  { %912 = vmatprep.subr.mxu1 %v1293_v13  ;;  %v64_v49 = vpop.permute.xlu1 %63 }
 0x465   :  { %vm78_vm8 = vcmp.eq.s32.totalorder %v1407_v54, %v64_v49 }
 0x466   :  { %v1106_v60 = vsel %vm78_vm8, 1.0, %v1250_v1 }
 0x469   :  { %v112_v51 = vpop.permute.xlu1 %111 }
 0x46a   :  { %vm126_vm9 = vcmp.eq.s32.totalorder %v1407_v54, %v112_v51 }
 0x46b   :  { %v1114_v61 = vsel %vm126_vm9, 1.0, %v1250_v1 }
 0x46c   :  { %v150_v2 = vadd.f32 %v1114_v61, %v1106_v60 }
 0x46d   :  { %v115_v57 = vpop.permute.xlu1 %114 }
 0x46e   :  { %vm127_vm11 = vcmp.eq.s32.totalorder %v1407_v54, %v115_v57 }
 0x46f   :  { %v1115_v5 = vsel %vm127_vm11, 1.0, %v1250_v1 }
 0x4ae   :  { %v264_v23 = vpop.f32.mrf.mxu0 }
 0x4b0   :  { %v266_v43 = vpop.f32.mrf.mxu0 }
 0x514   :  { %v582_v25 = vpop.f32.mrf.mxu1 }
 0x515   :  { %v587_v27 = vadd.f32 %v582_v25, %v264_v23 }
 0x516   :  { %v584_v35 = vpop.f32.mrf.mxu1 }
 0x517   :  { %v1123_v29 = vmul.f32 -1.442695, %v587_v27  ;;  %v594_v37 = vadd.f32 %v1433_v4, %v584_v35 }
 0x519   :  { %1166 = vpow2.f32 %v1123_v29 }
 0x526   :  { %v1167_v31 = vpop.eup %1166 }
 0x527   :  { %v591_v33 = vadd.f32 1.0, %v1167_v31 }
 0x529   :  { %1168 = vrcp.f32 %v591_v33 }
 0x536   :  { %v1169_v39 = vpop.eup %1168 }
 0x537   :  { %v595_v41 = vmul.f32 %v1169_v39, %v594_v37  ;;  %v598_v50 = vsub.f32 1.0, %v1169_v39  ;;  %v604_v53 = vmul.f32 %v1169_v39, %v1472_v62 }
 0x539   :  { %v596_v44 = vadd.f32 %v595_v41, %v266_v43 }
 0x53b   :  { %1170 = vtanh.f32 %v596_v44 }
 0x548   :  { %v1171_v45 = vpop.eup %1170 }
 0x549   :  { %600 = vrot.lane.b32.xlu0 %v1171_v45, %s1252_s29 }
 0x54d   :  { %108 = vperm.xlu0 %1148, %v43_v46  }
 0x551   :  { %1150 = vset.pattern.permute.xlu0 %v1249_v0  ;;  %v70_v0 = vpop.permute.xlu1 %69 }
 0x552   :  { %66 = vperm.xlu0 %1150, %v37_v12   ;;  %vm80_vm13 = vcmp.eq.s32.totalorder %v1407_v54, %v70_v0 }
 0x553   :  { %v1108_v9 = vsel %vm80_vm13, 1.0, %v1250_v1 }
 0x555   :  { %v73_v62 = vpop.permute.xlu1 %72 }
 0x556   :  { %1152 = vset.pattern.permute.xlu0 %v1251_v11  ;;  %v1105_v11 = vsel %vm77_vm7, 1.0, %v1250_v1  ;;  %vm81_vm15 = vcmp.eq.s32.totalorder %v1407_v54, %v73_v62 }
 0x557   :  { %117 = vperm.xlu0 %1152, %v46_v47   ;;  %v1109_v17 = vsel %vm81_vm15, 1.0, %v1250_v1 }
 0x559   :  { %v121_v7 = vpop.permute.xlu1 %120 }
 0x55a   :  { %vm129_vm0 = vcmp.eq.s32.totalorder %v1407_v54, %v121_v7 }
 0x55b   :  { %v1117_v19 = vsel %vm129_vm0, 1.0, %v1250_v1 }
 0x55c   :  { %v153_v21 = vadd.f32 %v1117_v19, %v1109_v17 }
 0x5bb   :  { %v601_v52 = vpop.permute.xlu0 %600 }
 0x5bc   :  { %v603_v55 = vmul.f32 %v601_v52, %v598_v50 }
 0x5be   :  { %v1522_v56 = vadd.f32 %v604_v53, %v603_v55 }
 0x5c0   :  { %607 = vrot.lane.b32.xlu0 %v1522_v56, %s1252_s29 }
 0x5c8   :  { %v109_v58 = vpop.permute.xlu0 %108 }
 0x5c9   :  { %vm125_vm10 = vcmp.eq.s32.totalorder %v1407_v54, %v109_v58 }
 0x5ca   :  { %v1113_v59 = vsel %vm125_vm10, 1.0, %v1250_v1 }
 0x5cb   :  { %v149_v63 = vadd.f32 %v1113_v59, %v1105_v11 }
 0x5cd   :  { %269 = vmatmul.mubr.f32.gmra.mxu0 %v149_v63  ;;  %v67_v3 = vpop.permute.xlu0 %66 }
 0x5ce   :  { %274 = vmatprep.mubr.f32.mxu0 %v1250_v1  ;;  %vm79_vm12 = vcmp.eq.s32.totalorder %v1407_v54, %v67_v3 }
 0x5cf   :  { %v1107_v6 = vsel %vm79_vm12, 1.0, %v1250_v1 }
 0x5d0   :  { %v151_v8 = vadd.f32 %v1115_v5, %v1107_v6 }
 0x5d1   :  { %275 = vmatmul.mubr.f32.gmra.mxu0 %v150_v2 }
 0x5d2   :  { %280 = vmatprep.mubr.f32.mxu0 %v1250_v1  ;;  %v118_v10 = vpop.permute.xlu0 %117 }
 0x5d3   :  { %vm128_vm14 = vcmp.eq.s32.totalorder %v1407_v54, %v118_v10 }
 0x5d4   :  { %v1116_v12 = vsel %vm128_vm14, 1.0, %v1250_v1 }
 0x5d5   :  { %v152_v14 = vadd.f32 %v1116_v12, %v1108_v9  ;;  %281 = vmatmul.mubr.f32.gmra.mxu0 %v151_v8 }
 0x5d6   :  { %286 = vmatprep.mubr.f32.mxu0 %v1250_v1 }
 0x5d9   :  { %287 = vmatmul.mubr.f32.gmra.mxu0 %v152_v14 }
 0x5da   :  { %292 = vmatprep.mubr.f32.mxu0 %v1250_v1 }
 0x5dd   :  { %293 = vmatmul.mubr.f32.gmra.mxu0 %v153_v21 }
 0x5de   :  { %675 = vmatprep.mubr.f32.mxu0 %v1250_v1 }
 0x632   :  { %v608_v23 = vpop.permute.xlu0 %607 }
 0x633   :  { %1124 = vmatmul.mubr.msk.f32.vlgmr.msra.gmra.mxu0 %vm322_vm4, %v608_v23 }
 0x634   :  { %818 = vmatpush1.msra.mxu0 %v1298_v15  ;;  %865 = vmatprep.mubr.f32.mxu0 %v1250_v1 }
 0x635   :  { %819 = vmatprep.subr.mxu0 %v1303_v16 }
 0x636   :  { %820 = vmatpush1.msra.mxu0 %v1309_v18 }
 0x637   :  { %821 = vmatprep.subr.mxu0 %v1315_v20 }
 0x638   :  { %822 = vmatpush1.msra.mxu0 %v1321_v22 }
 0x639   :  { %823 = vmatprep.subr.mxu0 %v1327_v24 }
 0x63a   :  { %824 = vmatpush1.msra.mxu0 %v1333_v26 }
 0x63b   :  { %825 = vmatprep.subr.mxu0 %v1339_v28 }
 0x63c   :  { %826 = vmatpush1.msra.mxu0 %v1345_v30 }
 0x63d   :  { %827 = vmatprep.subr.mxu0 %v1351_v32 }
 0x63e   :  { %828 = vmatpush1.msra.mxu0 %v1357_v34 }
 0x63f   :  { %829 = vmatprep.subr.mxu0 %v1363_v36 }
 0x640   :  { %830 = vmatpush1.msra.mxu0 %v1369_v38 }
 0x641   :  { %831 = vmatprep.subr.mxu0 %v1375_v40 }
 0x642   :  { %832 = vmatpush1.msra.mxu0 %v1381_v42 }
 0x643   :  { %1007 = vmatprep.subr.mxu0 %v1293_v13 }
 0x68d   :  { %v270_v54 = vpop.f32.mrf.mxu0 }
 0x68f   :  { %v272_v25 = vpop.f32.mrf.mxu0 }
 0x691   :  { %v276_v27 = vpop.f32.mrf.mxu0 }
 0x693   :  { %v278_v29 = vpop.f32.mrf.mxu0 }
 0x695   :  { %v1569_v31 = vpop.f32.mrf.mxu0 }
 0x697   :  { %v1571_v33 = vpop.f32.mrf.mxu0 }
 0x699   :  { %v1573_v35 = vpop.f32.mrf.mxu0 }
 0x69b   :  { %v1575_v37 = vpop.f32.mrf.mxu0 }
 0x69d   :  { %v1577_v39 = vpop.f32.mrf.mxu0 }
 0x69f   :  { %v1579_v41 = vpop.f32.mrf.mxu0 }
 0x6f3   :  { %v677_v43 = vpop.f32.mrf.mxu0 }
 0x6f4   :  { %v682_v44 = vadd.f32 %v677_v43, %v270_v54 }
 0x6f5   :  { %v679_v47 = vpop.f32.mrf.mxu0 }
 0x6f6   :  { %v1125_v45 = vmul.f32 -1.442695, %v682_v44  ;;  %v689_v48 = vadd.f32 %v1433_v4, %v679_v47 }
 0x6f8   :  { %1172 = vpow2.f32 %v1125_v45 }
 0x705   :  { %v1173_v13 = vpop.eup %1172 }
 0x706   :  { %v686_v46 = vadd.f32 1.0, %v1173_v13 }
 0x708   :  { %1174 = vrcp.f32 %v686_v46 }
 0x715   :  { %v1175_v49 = vpop.eup %1174 }
 0x716   :  { %v690_v50 = vmul.f32 %v1175_v49, %v689_v48  ;;  %v693_v53 = vsub.f32 1.0, %v1175_v49  ;;  %v699_v57 = vmul.f32 %v1175_v49, %v1522_v56 }
 0x718   :  { %v691_v51 = vadd.f32 %v690_v50, %v272_v25 }
 0x71a   :  { %1176 = vtanh.f32 %v691_v51 }
 0x727   :  { %v1177_v52 = vpop.eup %1176 }
 0x728   :  { %695 = vrot.lane.b32.xlu1 %v1177_v52, %s1252_s29 }
 0x79a   :  { %v696_v55 = vpop.permute.xlu1 %695 }
 0x79b   :  { %v698_v0 = vmul.f32 %v696_v55, %v693_v53 }
 0x79d   :  { %v700_v11 = vadd.f32 %v699_v57, %v698_v0 }
 0x79f   :  { %702 = vrot.lane.b32.xlu0 %v700_v11, %s1252_s29 }
 0x811   :  { %v703_v58 = vpop.permute.xlu0 %702 }
 0x812   :  { %1126 = vmatmul.mubr.msk.f32.vlgmr.msra.gmra.mxu1 %vm322_vm4, %v703_v58 }
 0x813   :  { %913 = vmatpush1.msra.mxu1 %v1298_v15  ;;  %960 = vmatprep.mubr.f32.mxu1 %v1250_v1 }
 0x814   :  { %914 = vmatprep.subr.mxu1 %v1303_v16 }
 0x815   :  { %915 = vmatpush1.msra.mxu1 %v1309_v18 }
 0x816   :  { %916 = vmatprep.subr.mxu1 %v1315_v20 }
 0x817   :  { %917 = vmatpush1.msra.mxu1 %v1321_v22 }
 0x818   :  { %918 = vmatprep.subr.mxu1 %v1327_v24 }
 0x819   :  { %919 = vmatpush1.msra.mxu1 %v1333_v26 }
 0x81a   :  { %920 = vmatprep.subr.mxu1 %v1339_v28 }
 0x81b   :  { %921 = vmatpush1.msra.mxu1 %v1345_v30 }
 0x81c   :  { %922 = vmatprep.subr.mxu1 %v1351_v32 }
 0x81d   :  { %923 = vmatpush1.msra.mxu1 %v1357_v34 }
 0x81e   :  { %924 = vmatprep.subr.mxu1 %v1363_v36 }
 0x81f   :  { %925 = vmatpush1.msra.mxu1 %v1369_v38 }
 0x820   :  { %926 = vmatprep.subr.mxu1 %v1375_v40 }
 0x821   :  { %927 = vmatpush1.msra.mxu1 %v1381_v42 }
 0x8d2   :  { %v772_v56 = vpop.f32.mrf.mxu1 }
 0x8d3   :  { %v777_v59 = vadd.f32 %v772_v56, %v276_v27 }
 0x8d4   :  { %v774_v63 = vpop.f32.mrf.mxu1 }
 0x8d5   :  { %v1127_v60 = vmul.f32 -1.442695, %v777_v59  ;;  %v784_v2 = vadd.f32 %v1433_v4, %v774_v63 }
 0x8d7   :  { %1178 = vpow2.f32 %v1127_v60 }
 0x8e4   :  { %v1179_v61 = vpop.eup %1178 }
 0x8e5   :  { %v781_v62 = vadd.f32 1.0, %v1179_v61 }
 0x8e7   :  { %1180 = vrcp.f32 %v781_v62 }
 0x8f4   :  { %v1181_v3 = vpop.eup %1180 }
 0x8f5   :  { %v785_v5 = vmul.f32 %v1181_v3, %v784_v2  ;;  %v788_v8 = vsub.f32 1.0, %v1181_v3  ;;  %v794_v10 = vmul.f32 %v1181_v3, %v700_v11 }
 0x8f7   :  { %v786_v6 = vadd.f32 %v785_v5, %v278_v29 }
 0x8f9   :  { %1182 = vtanh.f32 %v786_v6 }
 0x906   :  { %v1183_v7 = vpop.eup %1182 }
 0x907   :  { %790 = vrot.lane.b32.xlu1 %v1183_v7, %s1252_s29 }
 0x979   :  { %v791_v9 = vpop.permute.xlu1 %790 }
 0x97a   :  { %v793_v12 = vmul.f32 %v791_v9, %v788_v8 }
 0x97c   :  { %v795_v14 = vadd.f32 %v794_v10, %v793_v12 }
 0x97e   :  { %797 = vrot.lane.b32.xlu0 %v795_v14, %s1252_s29 }
 0x9f0   :  { %v798_v17 = vpop.permute.xlu0 %797 }
 0x9f1   :  { %1128 = vmatmul.mubr.msk.f32.vlgmr.msra.gmra.mxu0 %vm322_vm4, %v798_v17 }
 0x9f2   :  { %1008 = vmatpush1.msra.mxu0 %v1298_v15  ;;  %1055 = vmatprep.mubr.f32.mxu0 %v1250_v1 }
 0x9f3   :  { %1009 = vmatprep.subr.mxu0 %v1303_v16 }
 0x9f4   :  { %1010 = vmatpush1.msra.mxu0 %v1309_v18 }
 0x9f5   :  { %1011 = vmatprep.subr.mxu0 %v1315_v20 }
 0x9f6   :  { %1012 = vmatpush1.msra.mxu0 %v1321_v22 }
 0x9f7   :  { %1013 = vmatprep.subr.mxu0 %v1327_v24 }
 0x9f8   :  { %1014 = vmatpush1.msra.mxu0 %v1333_v26 }
 0x9f9   :  { %1015 = vmatprep.subr.mxu0 %v1339_v28 }
 0x9fa   :  { %1016 = vmatpush1.msra.mxu0 %v1345_v30 }
 0x9fb   :  { %1017 = vmatprep.subr.mxu0 %v1351_v32 }
 0x9fc   :  { %1018 = vmatpush1.msra.mxu0 %v1357_v34 }
 0x9fd   :  { %1019 = vmatprep.subr.mxu0 %v1363_v36 }
 0x9fe   :  { %1020 = vmatpush1.msra.mxu0 %v1369_v38 }
 0x9ff   :  { %1021 = vmatprep.subr.mxu0 %v1375_v40 }
 0xa00   :  { %1022 = vmatpush1.msra.mxu0 %v1381_v42 }
 0xab1   :  { %v867_v1 = vpop.f32.mrf.mxu0 }
 0xab2   :  { %v872_v15 = vadd.f32 %v867_v1, %v1569_v31 }
 0xab3   :  { %v869_v22 = vpop.f32.mrf.mxu0 }
 0xab4   :  { %v1129_v16 = vmul.f32 -1.442695, %v872_v15  ;;  %v879_v24 = vadd.f32 %v1433_v4, %v869_v22 }
 0xab6   :  { %1184 = vpow2.f32 %v1129_v16 }
 0xac3   :  { %v1185_v18 = vpop.eup %1184 }
 0xac4   :  { %v876_v20 = vadd.f32 1.0, %v1185_v18 }
 0xac6   :  { %1186 = vrcp.f32 %v876_v20 }
 0xad3   :  { %v1187_v26 = vpop.eup %1186 }
 0xad4   :  { %v880_v28 = vmul.f32 %v1187_v26, %v879_v24  ;;  %v883_v34 = vsub.f32 1.0, %v1187_v26  ;;  %v889_v38 = vmul.f32 %v1187_v26, %v795_v14 }
 0xad6   :  { %v881_v30 = vadd.f32 %v880_v28, %v1571_v33 }
 0xad8   :  { %1188 = vtanh.f32 %v881_v30 }
 0xae5   :  { %v1189_v32 = vpop.eup %1188 }
 0xae6   :  { %885 = vrot.lane.b32.xlu1 %v1189_v32, %s1252_s29 }
 0xb58   :  { %v886_v36 = vpop.permute.xlu1 %885 }
 0xb59   :  { %v888_v40 = vmul.f32 %v886_v36, %v883_v34 }
 0xb5b   :  { %v890_v42 = vadd.f32 %v889_v38, %v888_v40 }
 0xb5d   :  { %892 = vrot.lane.b32.xlu0 %v890_v42, %s1252_s29 }
 0xbcf   :  { %v893_v19 = vpop.permute.xlu0 %892 }
 0xbd0   :  { %1130 = vmatmul.mubr.msk.f32.vlgmr.msra.gmra.mxu1 %vm322_vm4, %v893_v19 }
 0xc90   :  { %v962_v21 = vpop.f32.mrf.mxu1 }
 0xc91   :  { %v967_v23 = vadd.f32 %v962_v21, %v1573_v35 }
 0xc92   :  { %v964_v29 = vpop.f32.mrf.mxu1 }
 0xc93   :  { %v1131_v54 = vmul.f32 -1.442695, %v967_v23  ;;  %v974_v31 = vadd.f32 %v1433_v4, %v964_v29 }
 0xc95   :  { %1190 = vpow2.f32 %v1131_v54 }
 0xca2   :  { %v1191_v25 = vpop.eup %1190 }
 0xca3   :  { %v971_v27 = vadd.f32 1.0, %v1191_v25 }
 0xca5   :  { %1192 = vrcp.f32 %v971_v27 }
 0xcb2   :  { %v1193_v33 = vpop.eup %1192 }
 0xcb3   :  { %v975_v43 = vmul.f32 %v1193_v33, %v974_v31  ;;  %v978_v13 = vsub.f32 1.0, %v1193_v33  ;;  %v984_v47 = vmul.f32 %v1193_v33, %v890_v42 }
 0xcb5   :  { %v976_v44 = vadd.f32 %v975_v43, %v1575_v37 }
 0xcb7   :  { %1194 = vtanh.f32 %v976_v44 }
 0xcc4   :  { %v1195_v45 = vpop.eup %1194 }
 0xcc5   :  { %980 = vrot.lane.b32.xlu1 %v1195_v45, %s1252_s29 }
 0xd37   :  { %v981_v46 = vpop.permute.xlu1 %980 }
 0xd38   :  { %v983_v35 = vmul.f32 %v981_v46, %v978_v13 }
 0xd3a   :  { %v985_v48 = vadd.f32 %v984_v47, %v983_v35 }
 0xd3c   :  { %987 = vrot.lane.b32.xlu0 %v985_v48, %s1252_s29 }
 0xdae   :  { %v988_v49 = vpop.permute.xlu0 %987 }
 0xdaf   :  { %1132 = vmatmul.mubr.msk.f32.vlgmr.msra.gmra.mxu0 %vm322_vm4, %v988_v49 }
 0xe6f   :  { %v1057_v50 = vpop.f32.mrf.mxu0 }
 0xe70   :  { %v1062_v51 = vadd.f32 %v1057_v50, %v1577_v39 }
 0xe71   :  { %v1059_v55 = vpop.f32.mrf.mxu0 }
 0xe72   :  { %v1133_v52 = vmul.f32 -1.442695, %v1062_v51  ;;  %v1069_v57 = vadd.f32 %v1433_v4, %v1059_v55 }
 0xe74   :  { %1196 = vpow2.f32 %v1133_v52 }
 0xe81   :  { %v1197_v37 = vpop.eup %1196 }
 0xe82   :  { %v1066_v53 = vadd.f32 1.0, %v1197_v37 }
 0xe84   :  { %1198 = vrcp.f32 %v1066_v53 }
 0xe91   :  { %v1199_v0 = vpop.eup %1198 }
 0xe92   :  { %v1070_v11 = vmul.f32 %v1199_v0, %v1069_v57  ;;  %v1073_v59 = vsub.f32 1.0, %v1199_v0  ;;  %v1079_v61 = vmul.f32 %v1199_v0, %v985_v48 }
 0xe94   :  { %v1071_v58 = vadd.f32 %v1070_v11, %v1579_v41 }
 0xe96   :  { %1200 = vtanh.f32 %v1071_v58 }
 0xea3   :  { %v1201_v56 = vpop.eup %1200 }
 0xea4   :  { %1075 = vrot.lane.b32.xlu1 %v1201_v56, %s1252_s29 }
 0xf16   :  { %v1076_v60 = vpop.permute.xlu1 %1075 }
 0xf17   :  { %v1078_v39 = vmul.f32 %v1076_v60, %v1073_v59 }
 0xf19   :  { %v1080_v62 = vadd.f32 %v1079_v61, %v1078_v39 }
 0xf1b   :  { %1082 = vrot.lane.b32.xlu0 %v1080_v62, %s1252_s29 }
 0xf8d   :  { %v1083_v4 = vpop.permute.xlu0 %1082 }
 0xf8e   :  { %1086 = vst.msk [vmem:[#allocation5] sm:$0x3] %vm1085_vm1, %v1083_v4 }
 0xf8f   :  { %1233 = shalt.err (!%p1230_p9)
}
 0xf90   :  { %1096 = dma.vmem_to_hbm [thread:$0]  %s1094_s17, 32, %s1646_s4, [#allocation4]  }
 0xf91   :  { %1244 = dma.done.wait [#allocation4], 32  }
 0xf92   :  { %1245 = vsyncadd [#allocation4], 4294967264 }
 0xf93   :  { %1100 = vsyncpa [#allocation3], 1 }
 0xf94   :  { %1101 = vsyncpa [#allocation4], 1 }

</bundles_post_ra>
